<compile_context>
chip_gen: v7x
topology: tpu7x:2x2x1
jax: 0.10.0
libtpu: 0.0.40
codegen_flags: <defaults>
</compile_context>

<pallas_src>
import jax
import jax.numpy as jnp
from jax.experimental import pallas as pl
from jax.experimental.pallas import tpu as pltpu

IN_FEATURES = 6
OUT_FEATURES = 3


def linear_kernel(x_ref, wt_ref, b_ref, o_ref):
    # x_ref : (B, 6)  f32
    # wt_ref: (6, 3)  f32   (weight already transposed in the wrapper)
    # b_ref : (1, 3)  f32
    # o_ref : (B, 3)
    x = x_ref[...]
    w = wt_ref[...]
    acc = b_ref[...]  # (1, 3); broadcasts to (B, 3) on first accumulate
    # Unrolled K=6 contraction on the VPU: 18 FMAs per row, no MXU involved.
    for k in range(IN_FEATURES):
        acc = acc + x[:, k:k + 1] * w[k:k + 1, :]
    o_ref[...] = acc.astype(o_ref.dtype)


def linear_model_6(x, weight, bias):
    """Forward pass of Linear_model_6: y = x @ W.T + b.

    weight: (out=3, in=6) torch layout; bias: (3,).
    """
    B = x.shape[0]
    # Hoist the transpose out of the kernel (done once at trace time).
    wt = weight.T.astype(jnp.float32)             # (6, 3)
    bias2d = bias.reshape(1, OUT_FEATURES).astype(jnp.float32)

    vmem = pltpu.MemorySpace.VMEM
    return pl.pallas_call(
        linear_kernel,
        out_shape=jax.ShapeDtypeStruct((B, OUT_FEATURES), x.dtype),
        in_specs=[
            pl.BlockSpec(memory_space=vmem),   # x   (B, 6)
            pl.BlockSpec(memory_space=vmem),   # w.T (6, 3)
            pl.BlockSpec(memory_space=vmem),   # b   (1, 3)
        ],
        out_specs=pl.BlockSpec(memory_space=vmem),
    )(x, wt, bias2d)


if __name__ == "__main__":
    key = jax.random.PRNGKey(0)
    kx, kw, kb = jax.random.split(key, 3)

    # Deterministic parameter init mimicking torch's default Linear init:
    # uniform(-1/sqrt(fan_in), 1/sqrt(fan_in)) with fan_in = 6.
    bound = 1.0 / jnp.sqrt(float(IN_FEATURES))
    weight = jax.random.uniform(
        kw, (OUT_FEATURES, IN_FEATURES), dtype=jnp.float32,
        minval=-bound, maxval=bound)
    bias = jax.random.uniform(
        kb, (OUT_FEATURES,), dtype=jnp.float32, minval=-bound, maxval=bound)

    # Small batch of inputs with in_features = 6.
    B = 8
    x = jax.random.normal(kx, (B, IN_FEATURES), dtype=jnp.float32)

    y = linear_model_6(x, weight, bias)
    jax.block_until_ready(y)

    # Sanity check against plain-JAX reference.
    y_ref = x @ weight.T + bias
    assert jnp.allclose(y, y_ref, atol=1e-5, rtol=1e-5)

    print("KERNEL_OK")
</pallas_src>

<mosaic_0001>
module attributes {stable_mosaic.version = 11 : i64} {
  func.func @linear_kernel(%arg0: memref<8x6xf32, #tpu.memory_space<vmem>>, %arg1: memref<6x3xf32, #tpu.memory_space<vmem>>, %arg2: memref<1x3xf32, #tpu.memory_space<vmem>>, %arg3: memref<8x3xf32, #tpu.memory_space<vmem>>) attributes {dimension_semantics = [], scalar_prefetch = 0 : i64, scratch_operands = 0 : i64, tpu.core_type = #tpu.core_type<tc>} {
    %c0 = arith.constant 0 : index
    %c0_0 = arith.constant 0 : index
    %0 = vector.load %arg0[%c0, %c0_0] : memref<8x6xf32, #tpu.memory_space<vmem>>, vector<8x6xf32>
    %c0_1 = arith.constant 0 : index
    %c0_2 = arith.constant 0 : index
    %1 = vector.load %arg1[%c0_1, %c0_2] : memref<6x3xf32, #tpu.memory_space<vmem>>, vector<6x3xf32>
    %c0_3 = arith.constant 0 : index
    %c0_4 = arith.constant 0 : index
    %2 = vector.load %arg2[%c0_3, %c0_4] : memref<1x3xf32, #tpu.memory_space<vmem>>, vector<1x3xf32>
    %3 = vector.extract_strided_slice %0 {offsets = [0, 0], sizes = [8, 1], strides = [1, 1]} : vector<8x6xf32> to vector<8x1xf32>
    %4 = vector.extract_strided_slice %1 {offsets = [0, 0], sizes = [1, 3], strides = [1, 1]} : vector<6x3xf32> to vector<1x3xf32>
    %5 = vector.broadcast %3 : vector<8x1xf32> to vector<8x3xf32>
    %6 = vector.broadcast %4 : vector<1x3xf32> to vector<8x3xf32>
    %7 = arith.mulf %5, %6 : vector<8x3xf32>
    %8 = vector.broadcast %2 : vector<1x3xf32> to vector<8x3xf32>
    %9 = arith.addf %8, %7 : vector<8x3xf32>
    %10 = vector.extract_strided_slice %0 {offsets = [0, 1], sizes = [8, 1], strides = [1, 1]} : vector<8x6xf32> to vector<8x1xf32>
    %11 = vector.extract_strided_slice %1 {offsets = [1, 0], sizes = [1, 3], strides = [1, 1]} : vector<6x3xf32> to vector<1x3xf32>
    %12 = vector.broadcast %10 : vector<8x1xf32> to vector<8x3xf32>
    %13 = vector.broadcast %11 : vector<1x3xf32> to vector<8x3xf32>
    %14 = arith.mulf %12, %13 : vector<8x3xf32>
    %15 = arith.addf %9, %14 : vector<8x3xf32>
    %16 = vector.extract_strided_slice %0 {offsets = [0, 2], sizes = [8, 1], strides = [1, 1]} : vector<8x6xf32> to vector<8x1xf32>
    %17 = vector.extract_strided_slice %1 {offsets = [2, 0], sizes = [1, 3], strides = [1, 1]} : vector<6x3xf32> to vector<1x3xf32>
    %18 = vector.broadcast %16 : vector<8x1xf32> to vector<8x3xf32>
    %19 = vector.broadcast %17 : vector<1x3xf32> to vector<8x3xf32>
    %20 = arith.mulf %18, %19 : vector<8x3xf32>
    %21 = arith.addf %15, %20 : vector<8x3xf32>
    %22 = vector.extract_strided_slice %0 {offsets = [0, 3], sizes = [8, 1], strides = [1, 1]} : vector<8x6xf32> to vector<8x1xf32>
    %23 = vector.extract_strided_slice %1 {offsets = [3, 0], sizes = [1, 3], strides = [1, 1]} : vector<6x3xf32> to vector<1x3xf32>
    %24 = vector.broadcast %22 : vector<8x1xf32> to vector<8x3xf32>
    %25 = vector.broadcast %23 : vector<1x3xf32> to vector<8x3xf32>
    %26 = arith.mulf %24, %25 : vector<8x3xf32>
    %27 = arith.addf %21, %26 : vector<8x3xf32>
    %28 = vector.extract_strided_slice %0 {offsets = [0, 4], sizes = [8, 1], strides = [1, 1]} : vector<8x6xf32> to vector<8x1xf32>
    %29 = vector.extract_strided_slice %1 {offsets = [4, 0], sizes = [1, 3], strides = [1, 1]} : vector<6x3xf32> to vector<1x3xf32>
    %30 = vector.broadcast %28 : vector<8x1xf32> to vector<8x3xf32>
    %31 = vector.broadcast %29 : vector<1x3xf32> to vector<8x3xf32>
    %32 = arith.mulf %30, %31 : vector<8x3xf32>
    %33 = arith.addf %27, %32 : vector<8x3xf32>
    %34 = vector.extract_strided_slice %0 {offsets = [0, 5], sizes = [8, 1], strides = [1, 1]} : vector<8x6xf32> to vector<8x1xf32>
    %35 = vector.extract_strided_slice %1 {offsets = [5, 0], sizes = [1, 3], strides = [1, 1]} : vector<6x3xf32> to vector<1x3xf32>
    %36 = vector.broadcast %34 : vector<8x1xf32> to vector<8x3xf32>
    %37 = vector.broadcast %35 : vector<1x3xf32> to vector<8x3xf32>
    %38 = arith.mulf %36, %37 : vector<8x3xf32>
    %39 = arith.addf %33, %38 : vector<8x3xf32>
    %c0_5 = arith.constant 0 : index
    %c0_6 = arith.constant 0 : index
    %40 = vector.load %arg3[%c0_5, %c0_6] : memref<8x3xf32, #tpu.memory_space<vmem>>, vector<8x3xf32>
    tpu.vector_store %arg3[%c0_5, %c0_6], %39 {strides = array<i32>} : memref<8x3xf32, #tpu.memory_space<vmem>>, vector<8x3xf32>,
    return
  }
}

</mosaic_0001>

<bundles_post_ra>
// kernel: tpu_custom_call.1
= control target key start
LH: loop header
LB: loop body
LE: loop exit
PB: predicated region body
PF: predicated region fallthrough
CT: control target
= control target key end

     0   :  { %v103_v0 = vmov 0   ;;  %v104_v1 = vmov 2   ;;  %v105_v3 = vmov 1   ;;  %v106_v4 = vmov 3   ;;  %s141_s0 = inlined_call_operand.vmem [shape: f32[8,6], index: 0, kind: input, shape index: {}]   ;;  %s142_s1 = inlined_call_operand.vmem [shape: f32[6,3], index: 1, kind: input, shape index: {}]   ;;  %s143_s2 = inlined_call_operand.vmem [shape: f32[1,3], index: 2, kind: input, shape index: {}]   ;;  %s144_s3 = inlined_call_operand.vmem [shape: f32[8,3], index: 3, kind: output, shape index: {}]  }
   0x1   :  { %97 = vset.pattern.permute.xlu0 %v103_v0  ;;  %99 = vset.pattern.permute.xlu1 %v104_v1  ;;  %v14_v2 = vld [vmem:[%s141_s0] sm:$0xff]  ;;  %v107_v5 = vmov 4   ;;  %v108_v6 = vmov 5   ;;  %v22_v7 = vlaneseq  ;;  %vm84_vm0 = vcmask 23552  }
   0x2   :  { %19 = vperm.xlu0 %97, %v14_v2   ;;  %45 = vperm.xlu1 %99, %v14_v2   ;;  %v15_v10 = vld [vmem:[%s142_s1] sm:$0x3f] }
   0x3   :  { %v23_v8 = vshrl.u32 %v22_v7, 7  ;;  %v90_v19 = vld [vmem:[%s143_s2] ss:$0 sm:$0xff] }
   0x5   :  { %v24_v9 = vsub.s32 0, %v23_v8  ;;  %v40_v12 = vsub.s32 1, %v23_v8  ;;  %v50_v14 = vsub.s32 2, %v23_v8  ;;  %v60_v18 = vsub.s32 3, %v23_v8 }
   0x6   :  { %98 = vset.pattern.permute.xlu0 %v105_v3  ;;  %100 = vset.pattern.permute.xlu1 %v106_v4  ;;  %v70_v20 = vsub.s32 4, %v23_v8  ;;  %v80_v22 = vsub.s32 5, %v23_v8 }
   0x7   :  { %35 = vperm.xlu0 %98, %v14_v2   ;;  %55 = vperm.xlu1 %100, %v14_v2   ;;  %v25_v11 = vrot.slane %v15_v10, %v24_v9  ;;  %v41_v17 = vrot.slane %v15_v10, %v40_v12  ;;  %v51_v21 = vrot.slane %v15_v10, %v50_v14 }
   0x8   :  { %v61_v27 = vrot.slane %v15_v10, %v60_v18  ;;  %v71_v28 = vrot.slane %v15_v10, %v70_v20  ;;  %v81_v31 = vrot.slane %v15_v10, %v80_v22 }
   0xb   :  { %101 = vset.pattern.permute.xlu1 %v107_v5  ;;  %102 = vset.pattern.permute.xlu0 %v108_v6 }
   0xc   :  { %65 = vperm.xlu1 %101, %v14_v2   ;;  %75 = vperm.xlu0 %102, %v14_v2  }
  0x81   :  { %v20_v13 = vpop.permute.xlu0 %19  ;;  %v46_v15 = vpop.permute.xlu1 %45 }
  0x82   :  { %v26_v16 = vmul.f32 %v25_v11, %v20_v13  ;;  %v52_v29 = vmul.f32 %v51_v21, %v46_v15 }
  0x84   :  { %v33_v25 = vadd.f32 %v90_v19, %v26_v16 }
  0x86   :  { %v36_v23 = vpop.permute.xlu0 %35  ;;  %v56_v24 = vpop.permute.xlu1 %55 }
  0x87   :  { %v42_v26 = vmul.f32 %v41_v17, %v36_v23  ;;  %v62_v33 = vmul.f32 %v61_v27, %v56_v24 }
  0x89   :  { %v43_v30 = vadd.f32 %v42_v26, %v33_v25 }
  0x8b   :  { %v53_v32 = vadd.f32 %v52_v29, %v43_v30  ;;  %v66_v34 = vpop.permute.xlu1 %65  ;;  %v76_v35 = vpop.permute.xlu0 %75 }
  0x8c   :  { %v72_v36 = vmul.f32 %v71_v28, %v66_v34  ;;  %v82_v38 = vmul.f32 %v81_v31, %v76_v35 }
  0x8d   :  { %v63_v37 = vadd.f32 %v62_v33, %v53_v32 }
  0x8f   :  { %v73_v39 = vadd.f32 %v72_v36, %v63_v37 }
  0x91   :  { %v83_v40 = vadd.f32 %v82_v38, %v73_v39 }
  0x93   :  { %85 = vst.msk [vmem:[%s144_s3] sm:$0xff] %vm84_vm0, %v83_v40 }

</bundles_post_ra>
